<compile_context>
chip_gen: v5e
topology: v5e:2x2
jax: 0.10.0
libtpu: 0.0.40
codegen_flags: <defaults>
</compile_context>

<pallas_src>
import functools

import jax
import jax.numpy as jnp
from jax.experimental import pallas as pl
from jax.experimental.pallas import tpu as pltpu


def mask_loss1_kernel(wm_ref, map_ref, o_ref, *, t, inv_n):
    # wm_ref : (B*6, tile_hw) VMEM  -- weight_mask rows (channel folded into rows)
    # map_ref: (3,   tile_hw) VMEM  -- map[0] channels
    # o_ref  : (1, 1)         SMEM  -- scalar loss accumulator (f32)
    i = pl.program_id(0)

    @pl.when(i == 0)
    def _init():
        o_ref[0, 0] = jnp.float32(0.0)

    mp = map_ref[...].astype(jnp.float32)  # (3, T)
    # convert_L exactly as the module: 0.114*ch0 + 0.587*ch1 + 0.299*ch2.
    map_l = 0.114 * mp[0:1, :] + 0.587 * mp[1:2, :] + 0.299 * mp[2:3, :]  # (1, T)
    removal = (map_l < t).astype(jnp.float32)   # map_removal[map_L < t] = 1
    inpaint = (map_l > t).astype(jnp.float32)   # map_inpainting[map_L > t] = 1

    wm = wm_ref[...].astype(jnp.float32)  # (B*6, T)
    # Row r of wm is channel (r % 6) of some batch element: channels 0..2 are
    # compared against map_removal, channels 3..5 against map_inpainting.
    # Selecting via an iota avoids the 0:3 / 3:6 sublane slices that would
    # materialize sub-tile VMEM copies.
    ch = jax.lax.broadcasted_iota(jnp.int32, wm.shape, 0) % 6
    target = jnp.where(ch < 3, removal, inpaint)  # (B*6, T) via row broadcast

    d = jnp.abs(wm - target)
    partial = jnp.sum(d, axis=0, keepdims=True)   # sublane partial sums (VPU)
    o_ref[0, 0] += jnp.sum(partial)               # one final cross-lane reduce

    @pl.when(i == pl.num_programs(0) - 1)
    def _finalize():
        # mean(|mr - tr|) + mean(|mi - ti|) == (sum of both slabs) / (B*3*HW)
        o_ref[0, 0] = o_ref[0, 0] * inv_n


def _pick_tile_hw(hw, b6, vmem_budget_bytes=8 * 1024 * 1024):
    """Largest lane tile (hw itself, or a multiple-of-128 divisor of hw) whose
    double-buffered f32 footprint stays under a budget safe for v5e/v7x."""
    rows = b6 + 3
    cap = max(128, vmem_budget_bytes // (2 * rows * 4))
    if hw <= cap:
        return hw
    t = (cap // 128) * 128
    while t >= 128:
        if hw % t == 0:
            return t
        t -= 128
    return hw  # no aligned divisor found: fall back to one full-width tile


def mask_loss1(weight_mask, map_img, t=0.1):
    """weight_mask: (B, 6, H, W); map_img: (1, 3, H, W). Returns scalar f32."""
    B, C6, H, W = weight_mask.shape
    assert C6 == 6, "MaskLoss1 expects 6 weight-mask channels"
    HW = H * W
    B6 = B * C6

    # Lane/sublane-dense flattening; no wrapper-side dtype cast (cast at load).
    wm = weight_mask.reshape(B6, HW)
    mp = map_img[0].reshape(3, HW)  # the module only reads map[0]

    tile_hw = _pick_tile_hw(HW, B6)
    grid = (HW // tile_hw,)

    n = B * 3 * HW  # elements per L1-mean slab (static)

    # Advisory cost hint so XLA schedules sensibly around the custom call.
    flops = 7 * HW + 4 * B6 * HW
    bytes_accessed = wm.size * wm.dtype.itemsize + mp.size * mp.dtype.itemsize + 4

    out = pl.pallas_call(
        functools.partial(mask_loss1_kernel, t=float(t), inv_n=1.0 / float(n)),
        out_shape=jax.ShapeDtypeStruct((1, 1), jnp.float32),
        grid=grid,
        in_specs=[
            pl.BlockSpec((B6, tile_hw), lambda i: (0, i)),
            pl.BlockSpec((3, tile_hw), lambda i: (0, i)),
        ],
        out_specs=pl.BlockSpec((1, 1), lambda i: (0, 0), memory_space=pltpu.SMEM),
        compiler_params=pltpu.CompilerParams(
            dimension_semantics=("arbitrary",),   # lane axis is a reduction
            allow_input_fusion=[True, True],      # let the reshapes fuse in
        ),
        cost_estimate=pl.CostEstimate(
            flops=flops, transcendentals=0, bytes_accessed=bytes_accessed
        ),
    )(wm, mp)
    return out[0, 0]


def mask_loss1_ref(weight_mask, map_img, t=0.1):
    """Pure-JAX reference matching the PyTorch forward exactly."""
    wm = weight_mask.astype(jnp.float32)
    mp = map_img.astype(jnp.float32)
    map_l = (0.114 * mp[0, 0] + 0.587 * mp[0, 1] + 0.299 * mp[0, 2])[None, None]
    map_removal = (map_l < t).astype(jnp.float32)
    map_inpaint = (map_l > t).astype(jnp.float32)
    mask_removal = wm[:, 0:3]
    mask_inpaint = wm[:, 3:6]
    loss1 = jnp.mean(jnp.abs(mask_removal - map_removal))
    loss2 = jnp.mean(jnp.abs(mask_inpaint - map_inpaint))
    return loss1 + loss2


if __name__ == "__main__":
    key = jax.random.PRNGKey(0)
    k1, k2 = jax.random.split(key)

    B, H, W = 2, 16, 16
    weight_mask = jax.random.uniform(k1, (B, 6, H, W), dtype=jnp.float32)
    map_img = jax.random.uniform(k2, (1, 3, H, W), dtype=jnp.float32)

    loss = jax.block_until_ready(mask_loss1(weight_mask, map_img, t=0.1))
    ref = jax.block_until_ready(mask_loss1_ref(weight_mask, map_img, t=0.1))
    assert jnp.allclose(loss, ref, rtol=1e-5, atol=1e-6), (loss, ref)

    print("KERNEL_OK")
</pallas_src>

<mosaic_0001>
module attributes {stable_mosaic.version = 11 : i64} {
  func.func @mask_loss1_kernel(%arg0: i32, %arg1: memref<12x256xf32, #tpu.memory_space<vmem>>, %arg2: memref<3x256xf32, #tpu.memory_space<vmem>>, %arg3: memref<1x1xf32, #tpu.memory_space<smem>>) attributes {dimension_semantics = [#tpu.dimension_semantics<arbitrary>], iteration_bounds = array<i64: 1>, scalar_prefetch = 0 : i64, scratch_operands = 0 : i64, tpu.core_type = #tpu.core_type<tc>, window_params = [{transform_indices = @transform_0, window_bounds = array<i64: 12, 256>}, {transform_indices = @transform_1, window_bounds = array<i64: 3, 256>}, {transform_indices = @transform_2, window_bounds = array<i64: 1, 1>}]} {
    %c0_i32 = arith.constant 0 : i32
    %0 = arith.cmpi eq, %arg0, %c0_i32 : i32
    %1 = arith.extui %0 : i1 to i32
    %c0_i32_0 = arith.constant 0 : i32
    %2 = arith.cmpi ne, %1, %c0_i32_0 : i32
    scf.if %2 {
      %cst_20 = arith.constant 0.000000e+00 : f32
      %c0_21 = arith.constant 0 : index
      %c0_22 = arith.constant 0 : index
      %62 = memref.load %arg3[%c0_21, %c0_22] : memref<1x1xf32, #tpu.memory_space<smem>>
      memref.store %cst_20, %arg3[%c0_21, %c0_22] : memref<1x1xf32, #tpu.memory_space<smem>>
    } else {
    }
    %c0 = arith.constant 0 : index
    %c0_1 = arith.constant 0 : index
    %3 = vector.load %arg2[%c0, %c0_1] : memref<3x256xf32, #tpu.memory_space<vmem>>, vector<3x256xf32>
    %4 = vector.extract_strided_slice %3 {offsets = [0, 0], sizes = [1, 256], strides = [1, 1]} : vector<3x256xf32> to vector<1x256xf32>
    %cst = arith.constant 1.140000e-01 : f32
    %5 = vector.broadcast %cst : f32 to vector<1x256xf32>
    %6 = arith.mulf %5, %4 : vector<1x256xf32>
    %7 = vector.extract_strided_slice %3 {offsets = [1, 0], sizes = [1, 256], strides = [1, 1]} : vector<3x256xf32> to vector<1x256xf32>
    %cst_2 = arith.constant 5.870000e-01 : f32
    %8 = vector.broadcast %cst_2 : f32 to vector<1x256xf32>
    %9 = arith.mulf %8, %7 : vector<1x256xf32>
    %10 = arith.addf %6, %9 : vector<1x256xf32>
    %11 = vector.extract_strided_slice %3 {offsets = [2, 0], sizes = [1, 256], strides = [1, 1]} : vector<3x256xf32> to vector<1x256xf32>
    %cst_3 = arith.constant 2.990000e-01 : f32
    %12 = vector.broadcast %cst_3 : f32 to vector<1x256xf32>
    %13 = arith.mulf %12, %11 : vector<1x256xf32>
    %14 = arith.addf %10, %13 : vector<1x256xf32>
    %cst_4 = arith.constant 1.000000e-01 : f32
    %15 = vector.broadcast %cst_4 : f32 to vector<1x256xf32>
    %16 = arith.cmpf olt, %14, %15 : vector<1x256xf32>
    %17 = arith.extui %16 : vector<1x256xi1> to vector<1x256xi32>
    %18 = arith.sitofp %17 : vector<1x256xi32> to vector<1x256xf32>
    %cst_5 = arith.constant 1.000000e-01 : f32
    %19 = vector.broadcast %cst_5 : f32 to vector<1x256xf32>
    %20 = arith.cmpf ogt, %14, %19 : vector<1x256xf32>
    %21 = arith.extui %20 : vector<1x256xi1> to vector<1x256xi32>
    %22 = arith.sitofp %21 : vector<1x256xi32> to vector<1x256xf32>
    %c0_6 = arith.constant 0 : index
    %c0_7 = arith.constant 0 : index
    %23 = vector.load %arg1[%c0_6, %c0_7] : memref<12x256xf32, #tpu.memory_space<vmem>>, vector<12x256xf32>
    %24 = tpu.iota {dimensions = array<i32: 0>} : vector<12x256xi32>
    %c6_i32 = arith.constant 6 : i32
    %c0_i32_8 = arith.constant 0 : i32
    %25 = arith.cmpi eq, %c6_i32, %c0_i32_8 : i32
    %c1_i32 = arith.constant 1 : i32
    %26 = arith.select %25, %c1_i32, %c6_i32 : i32
    %27 = vector.broadcast %26 : i32 to vector<12x256xi32>
    %28 = arith.remsi %24, %27 : vector<12x256xi32>
    %c0_i32_9 = arith.constant 0 : i32
    %29 = vector.broadcast %c0_i32_9 : i32 to vector<12x256xi32>
    %30 = arith.cmpi ne, %28, %29 : vector<12x256xi32>
    %c0_i32_10 = arith.constant 0 : i32
    %31 = vector.broadcast %c0_i32_10 : i32 to vector<12x256xi32>
    %32 = arith.cmpi slt, %28, %31 : vector<12x256xi32>
    %c0_i32_11 = arith.constant 0 : i32
    %33 = arith.cmpi slt, %26, %c0_i32_11 : i32
    %34 = vector.broadcast %33 : i1 to vector<12x256xi1>
    %35 = vector.broadcast %34 : vector<12x256xi1> to vector<12x256xi1>
    %36 = arith.xori %32, %35 : vector<12x256xi1>
    %37 = arith.andi %36, %30 : vector<12x256xi1>
    %38 = vector.broadcast %26 : i32 to vector<12x256xi32>
    %39 = arith.addi %28, %38 : vector<12x256xi32>
    %40 = arith.select %37, %39, %28 : vector<12x256xi1>, vector<12x256xi32>
    %c3_i32 = arith.constant 3 : i32
    %41 = vector.broadcast %c3_i32 : i32 to vector<12x256xi32>
    %42 = arith.cmpi slt, %40, %41 : vector<12x256xi32>
    %43 = vector.shape_cast %18 : vector<1x256xf32> to vector<1x256xf32>
    %44 = vector.broadcast %43 : vector<1x256xf32> to vector<12x256xf32>
    %45 = vector.shape_cast %22 : vector<1x256xf32> to vector<1x256xf32>
    %46 = vector.broadcast %45 : vector<1x256xf32> to vector<12x256xf32>
    %47 = arith.select %42, %44, %46 : vector<12x256xi1>, vector<12x256xf32>
    %48 = arith.subf %23, %47 : vector<12x256xf32>
    %49 = math.absf %48 : vector<12x256xf32>
    %cst_12 = arith.constant dense<0.000000e+00> : vector<256xf32>
    %50 = vector.multi_reduction <add>, %49, %cst_12 [0] : vector<12x256xf32> to vector<256xf32>
    %51 = vector.shape_cast %50 : vector<256xf32> to vector<1x256xf32>
    %c0_13 = arith.constant 0 : index
    %c0_14 = arith.constant 0 : index
    %52 = memref.load %arg3[%c0_13, %c0_14] : memref<1x1xf32, #tpu.memory_space<smem>>
    %53 = vector.shape_cast %51 : vector<1x256xf32> to vector<1x1x256xf32>
    %cst_15 = arith.constant dense<0.000000e+00> : vector<1xf32>
    %54 = vector.multi_reduction <add>, %53, %cst_15 [1, 2] : vector<1x1x256xf32> to vector<1xf32>
    %55 = vector.shape_cast %54 : vector<1xf32> to vector<1x1x1xf32>
    %56 = vector.extract %55[0, 0, 0] : f32 from vector<1x1x1xf32>
    %57 = arith.addf %52, %56 : f32
    %c0_16 = arith.constant 0 : index
    %c0_17 = arith.constant 0 : index
    %58 = memref.load %arg3[%c0_16, %c0_17] : memref<1x1xf32, #tpu.memory_space<smem>>
    memref.store %57, %arg3[%c0_16, %c0_17] : memref<1x1xf32, #tpu.memory_space<smem>>
    %c0_i32_18 = arith.constant 0 : i32
    %59 = arith.cmpi eq, %arg0, %c0_i32_18 : i32
    %60 = arith.extui %59 : i1 to i32
    %c0_i32_19 = arith.constant 0 : i32
    %61 = arith.cmpi ne, %60, %c0_i32_19 : i32
    scf.if %61 {
      %c0_20 = arith.constant 0 : index
      %c0_21 = arith.constant 0 : index
      %62 = memref.load %arg3[%c0_20, %c0_21] : memref<1x1xf32, #tpu.memory_space<smem>>
      %cst_22 = arith.constant 6.51041686E-4 : f32
      %63 = arith.mulf %62, %cst_22 : f32
      %c0_23 = arith.constant 0 : index
      %c0_24 = arith.constant 0 : index
      %64 = memref.load %arg3[%c0_23, %c0_24] : memref<1x1xf32, #tpu.memory_space<smem>>
      memref.store %63, %arg3[%c0_23, %c0_24] : memref<1x1xf32, #tpu.memory_space<smem>>
    } else {
    }
    return
  }
  func.func @transform_0(%arg0: i32) -> (i32, i32) {
    %c0_i32 = arith.constant 0 : i32
    %c0_i32_0 = arith.constant 0 : i32
    return %c0_i32, %arg0 : i32, i32
  }
  func.func @transform_1(%arg0: i32) -> (i32, i32) {
    %c0_i32 = arith.constant 0 : i32
    %c0_i32_0 = arith.constant 0 : i32
    return %c0_i32, %arg0 : i32, i32
  }
  func.func @transform_2(%arg0: i32) -> (i32, i32) {
    %c0_i32 = arith.constant 0 : i32
    %c0_i32_0 = arith.constant 0 : i32
    %c0_i32_1 = arith.constant 0 : i32
    return %c0_i32, %c0_i32_0 : i32, i32
  }
}

</mosaic_0001>

<bundles_post_ra>
// kernel: tpu_custom_call.1
= control target key start
LH: loop header
LB: loop body
LE: loop exit
PB: predicated region body
PF: predicated region fallthrough
CT: control target
= control target key end

     0   :  { %7 = vsyncpa [#allocation3], 0  ;;  %s344_s0 = inlined_call_operand.hbm [shape: f32[12,256], index: 0, kind: input, shape index: {}]   ;;  %s345_s1 = inlined_call_operand.hbm [shape: f32[3,256], index: 1, kind: input, shape index: {}]   ;;  %s346_s2 = inlined_call_operand.hbm [shape: f32[1,1], index: 2, kind: output, shape index: {}]  }
   0x1   :  { %8 = vsyncpa [#allocation6], 0 }
   0x2   :  { %9 = vsyncpa [#allocation4], 0  ;;  %s14_s11 = sshll.u32 %s344_s0, 4  ;;  %s308_s12 = smov [#allocation2]   ;;  %s15_s11 = int_to_ptr.hbm [resolvable:$true] %s14_s11 }
   0x3   :  { %s16_s13 = sshll.u32 %s308_s12, 4  ;;  %s28_s16 = sshll.u32 %s345_s1, 4  ;;  %s17_s13 = int_to_ptr.vmem [resolvable:$true] %s16_s13  ;;  %s29_s16 = int_to_ptr.hbm [resolvable:$true] %s28_s16 }
   0x4   :  { %s309_s17 = smov 256   ;;  %s310_s18 = smov 16  }
   0x5   :  { %22 = dma.hbm_to_vmem [thread:$0]  %s15_s11, 512, %s17_s13, [#allocation3], %s309_s17, %s309_s17, %s310_s18  }
   0x6   :  { %s311_s19 = smov [#allocation5]  }
   0x7   :  { %s30_s20 = sshll.u32 %s311_s19, 4  ;;  %s31_s20 = int_to_ptr.vmem [resolvable:$true] %s30_s20 }
   0x8   :  { %33 = dma.hbm_to_vmem [thread:$0]  %s29_s16, 128, %s31_s20, [#allocation6]  }
   0x9   :  { %302 = dma.done.wait [#allocation3], 512  }
   0xa   :  { %303 = vsyncadd [#allocation3], 4294966784 }
   0xb   :  { %304 = dma.done.wait [#allocation6], 128  }
   0xc   :  { %305 = vsyncadd [#allocation6], 4294967168  ;;  %v72_v0 = vlaneseq  ;;  %v48_v7 = vld [vmem:[#allocation5] sm:$0x77]  ;;  %v312_v24 = vmov 0   ;;  %v313_v40 = vmov 0.0  }
   0xd   :  { %v49_v11 = vmul.f32 0.114, %v48_v7  ;;  %v50_v12 = vmul.f32 0.587, %v48_v7  ;;  %v56_v13 = vmul.f32 0.299, %v48_v7 }
   0xe   :  { %v73_v1 = vshrl.u32 %v72_v0, 7  ;;  %v70_v7 = vld [vmem:[#allocation2 + $0x10] sm:$0xf]  ;;  %vm171_vm14 = vcmask 1043456   ;;  %vm189_vm15 = vcmask 1040384   ;;  %s216_s21 = sshll.u32 %s346_s2, 4  ;;  %s217_s21 = int_to_ptr.hbm [resolvable:$true] %s216_s21 }
   0xf   :  { %v228_v16 = vrot.slane %v50_v12, 9  ;;  %v229_v17 = vrot.slane %v56_v13, 10  ;;  %s314_s24 = smov [#allocation7]  }
  0x10   :  { %v336_v2 = vadd.s32 8, %v73_v1  ;;  %v78_v3 = vand.u32 65535, %v73_v1  ;;  %v79_v4 = vshrl.u32 %v73_v1, 16 }
  0x11   :  { %v55_v22 = vadd.f32 %v228_v16, %v49_v11 }
  0x12   :  { %v82_v5 = vmul.u32 43690, %v78_v3  ;;  %v83_v6 = vmul.u32 43691, %v79_v4  ;;  %v81_v8 = vmul.u32 43691, %v78_v3  ;;  %v107_v9 = vand.u32 65535, %v336_v2  ;;  %v68_v3 = vld [vmem:[#allocation2] sm:$0xff] }
  0x13   :  { %v108_v10 = vshrl.u32 %v336_v2, 16  ;;  %v84_v14 = vmul.u32 43690, %v79_v4  ;;  %v61_v30 = vadd.f32 %v229_v17, %v55_v22  ;;  %v69_v4 = vld [vmem:[#allocation2 + $0x8] sm:$0xff] }
  0x14   :  { %v85_v15 = vshll.u32 %v82_v5, 16  ;;  %v87_v18 = vshll.u32 %v83_v6, 16  ;;  %v110_v20 = vmul.u32 43691, %v107_v9  ;;  %v111_v21 = vmul.u32 43690, %v107_v9 }
  0x15   :  { %v86_v23 = vshrl.u32 %v82_v5, 16  ;;  %v112_v26 = vmul.u32 43691, %v108_v10  ;;  %v113_v28 = vmul.u32 43690, %v108_v10  ;;  %v88_v33 = vshrl.u32 %v83_v6, 16 }
  0x16   :  { %vm89_vm0 = vc.u32 %v81_v8, %v85_v15  ;;  %v91_v19 = vadd.s32 %v85_v15, %v81_v8  ;;  %v114_v29 = vshll.u32 %v111_v21, 16  ;;  %vm62_vm3 = vcmp.lt.f32.partialorder %v61_v30, 0.1  ;;  %v71_v8 = vld [vmem:[#allocation2 + $0x18] sm:$0xf] }
  0x17   :  { %v90_v25 = vsel %vm89_vm0, 1, %v312_v24  ;;  %v116_v32 = vshll.u32 %v112_v26, 16  ;;  %vm65_vm4 = vcmp.gt.f32.partialorder %v61_v30, 0.1  ;;  %v115_v39 = vshrl.u32 %v111_v21, 16 }
  0x18   :  { %v92_v27 = vadd.s32 %v90_v25, %v84_v14  ;;  %vm93_vm1 = vc.u32 %v91_v19, %v87_v18  ;;  %vm118_vm2 = vc.u32 %v110_v20, %v114_v29  ;;  %v120_v35 = vadd.s32 %v114_v29, %v110_v20 }
  0x19   :  { %v94_v31 = vsel %vm93_vm1, 1, %v312_v24  ;;  %v119_v36 = vsel %vm118_vm2, 1, %v312_v24  ;;  %v230_v41 = vsel %vm62_vm3, 1.0, %v313_v40  ;;  %v231_v42 = vsel %vm65_vm4, 1.0, %v313_v40 }
  0x1a   :  { %v96_v34 = vadd.s32 %v94_v31, %v92_v27  ;;  %v121_v38 = vadd.s32 %v119_v36, %v113_v28  ;;  %vm122_vm5 = vc.u32 %v120_v35, %v116_v32  ;;  %v117_v45 = vshrl.u32 %v112_v26, 16 }
  0x1b   :  { %v123_v44 = vsel %vm122_vm5, 1, %v312_v24  ;;  %v146_v49 = vperm.slane %v230_v41, 0  ;;  %v147_v50 = vperm.slane %v230_v41, 4  ;;  %v153_v51 = vperm.slane %v231_v42, 0 }
  0x1c   :  { %v97_v37 = vadd.s32 %v96_v34, %v86_v23  ;;  %v125_v46 = vadd.s32 %v123_v44, %v121_v38  ;;  %v154_v53 = vperm.slane %v231_v42, 4 }
  0x1d   :  { %v150_v57 = vperm.slane %v146_v49, 0  ;;  %v151_v58 = vperm.slane %v147_v50, 0  ;;  %v157_v59 = vperm.slane %v153_v51, 0 }
  0x1e   :  { %v98_v43 = vadd.s32 %v97_v37, %v88_v33  ;;  %v126_v48 = vadd.s32 %v125_v46, %v115_v39  ;;  %v158_v61 = vperm.slane %v154_v53, 0 }
  0x20   :  { %v99_v47 = vshrl.u32 %v98_v43, 2  ;;  %v127_v54 = vadd.s32 %v126_v48, %v117_v45 }
  0x22   :  { %v100_v52 = vmul.u32 6, %v99_v47  ;;  %v128_v56 = vshrl.u32 %v127_v54, 2 }
  0x24   :  { %v101_v55 = vsub.s32 %v73_v1, %v100_v52  ;;  %v129_v62 = vmul.u32 6, %v128_v56 }
  0x26   :  { %vm133_vm6 = vcmp.ne.s32.totalorder %v101_v55, 0  ;;  %vm135_vm7 = vcmp.lt.s32.totalorder %v101_v55, 0  ;;  %v139_v60 = vadd.s32 6, %v101_v55  ;;  %v130_v0 = vsub.s32 %v336_v2, %v129_v62 }
  0x27   :  { %vm137_vm8 = vmand %vm135_vm7, %vm133_vm6 }
  0x28   :  { %v141_v63 = vsel %vm137_vm8, %v139_v60, %v101_v55  ;;  %vm134_vm10 = vcmp.ne.s32.totalorder %v130_v0, 0  ;;  %vm136_vm11 = vcmp.lt.s32.totalorder %v130_v0, 0  ;;  %v140_v1 = vadd.s32 6, %v130_v0 }
  0x29   :  { %vm143_vm9 = vcmp.lt.s32.totalorder %v141_v63, 3  ;;  %vm138_vm12 = vmand %vm136_vm11, %vm134_vm10 }
  0x2a   :  { %v159_v5 = vsel %vm143_vm9, %v150_v57, %v157_v59  ;;  %v160_v6 = vsel %vm143_vm9, %v151_v58, %v158_v61  ;;  %v142_v9 = vsel %vm138_vm12, %v140_v1, %v130_v0 }
  0x2b   :  { %v163_v10 = vsub.f32 %v68_v3, %v159_v5  ;;  %v164_v11 = vsub.f32 %v69_v4, %v160_v6  ;;  %vm144_vm13 = vcmp.lt.s32.totalorder %v142_v9, 3 }
  0x2c   :  { %v161_v12 = vsel %vm144_vm13, %v150_v57, %v157_v59  ;;  %v162_v13 = vsel %vm144_vm13, %v151_v58, %v158_v61 }
  0x2d   :  { %v165_v14 = vsub.f32 %v70_v7, %v161_v12  ;;  %v166_v15 = vsub.f32 %v71_v8, %v162_v13  ;;  %v167_v2 = vand.u32 2147483647, %v163_v10  ;;  %v168_v16 = vand.u32 2147483647, %v164_v11 }
  0x2f   :  { %v169_v17 = vand.u32 2147483647, %v165_v14  ;;  %v170_v18 = vand.u32 2147483647, %v166_v15 }
  0x31   :  { %v172_v19 = vsel %vm171_vm14, %v169_v17, 0.0  ;;  %v180_v20 = vsel %vm171_vm14, %v170_v18, 0.0 }
  0x32   :  { %v173_v21 = vadd.f32 %v172_v19, %v167_v2  ;;  %v181_v22 = vadd.f32 %v180_v20, %v168_v16 }
  0x34   :  { %v174_v23 = vrot.slane %v173_v21, 4  ;;  %v182_v24 = vrot.slane %v181_v22, 4 }
  0x36   :  { %v175_v25 = vadd.f32 %v174_v23, %v173_v21  ;;  %v183_v26 = vadd.f32 %v182_v24, %v181_v22 }
  0x38   :  { %v176_v27 = vrot.slane %v175_v25, 2  ;;  %v184_v28 = vrot.slane %v183_v26, 2 }
  0x3a   :  { %v177_v29 = vadd.f32 %v176_v27, %v175_v25  ;;  %v185_v30 = vadd.f32 %v184_v28, %v183_v26 }
  0x3c   :  { %v178_v31 = vrot.slane %v177_v29, 1  ;;  %v186_v32 = vrot.slane %v185_v30, 1 }
  0x3e   :  { %v179_v33 = vadd.f32 %v178_v31, %v177_v29  ;;  %v187_v34 = vadd.f32 %v186_v32, %v185_v30 }
  0x40   :  { %v190_v35 = vsel %vm189_vm15, %v179_v33, 0.0  ;;  %v191_v36 = vsel %vm189_vm15, %v187_v34, 0.0 }
  0x41   :  { %v192_v37 = vadd.f32 %v191_v36, %v190_v35 }
  0x43   :  { %193 = vadd.xlane.f32.xlu0 %v192_v37 }
  0xb6   :  { %v194_v38 = vpop.xlane.xlu0 %193 }
  0xb7   :  { %v195_v39 = vrot.slane %v194_v38, 4 }
  0xb9   :  { %v196_v40 = vadd.f32 %v195_v39, %v194_v38 }
  0xbb   :  { %v197_v41 = vrot.slane %v196_v40, 2 }
  0xbd   :  { %v198_v42 = vadd.f32 %v197_v41, %v196_v40 }
  0xbf   :  { %v199_v43 = vrot.slane %v198_v42, 1 }
  0xc1   :  { %v200_v44 = vadd.f32 %v199_v43, %v198_v42 }
  0xc3   :  { %232 = vpush %v200_v44 }
  0xf4   :  { %s233_s22 = spop %232 }
  0xf5   :  { %s209_s23 = smul.f32 0.0006510417, %s233_s22 }
  0xf7   :  { %210 = sst [smem:[#allocation7]] %s209_s23 }
  0xf8   :  { %219 = dma.smem_to_hbm %s314_s24, 16, %s217_s21, [#allocation4]  }
  0xf9   :  { %306 = dma.done.wait [#allocation4], 16  }
  0xfa   :  { %307 = vsyncadd [#allocation4], 4294967280 }
  0xfb   :  { %224 = sfence }
  0xfc   :  { %225 = vsyncpa [#allocation3], 1 }
  0xfd   :  { %226 = vsyncpa [#allocation6], 1 }
  0xfe   :  { %227 = vsyncpa [#allocation4], 1 }

</bundles_post_ra>
